<compile_context>
chip_gen: v5e
topology: v5e:2x2
jax: 0.10.0
libtpu: 0.0.40
codegen_flags: <defaults>
</compile_context>

<pallas_src>
import functools

import jax
import jax.numpy as jnp
from jax import lax
from jax.experimental import pallas as pl
from jax.experimental.pallas import tpu as pltpu


def _cutout_kernel(rect_f_ref, rect_t_ref, x_ref, o_ref,
                   *, n_regions, rect_freq, rect_time, block_batch):
    # rect_f_ref / rect_t_ref: SMEM int32 arrays of shape (nb * bb * R,)
    # x_ref / o_ref: VMEM refs of shape (block_batch, Fb, T)
    bblk = pl.program_id(0)
    fblk = pl.program_id(1)
    _, Fb, T = x_ref.shape
    f_off = fblk * Fb  # global freq offset of this F block

    # 1-D (column / row) iotas: compares stay on (Fb,1) and (1,T) vectors;
    # only the AND-broadcast and OR touch the full (Fb, T) tile.
    freq_idx = f_off + lax.broadcasted_iota(jnp.int32, (Fb, 1), 0)
    time_idx = lax.broadcasted_iota(jnp.int32, (1, T), 1)
    zero = jnp.zeros((), x_ref.dtype)

    for i in range(block_batch):
        base = (bblk * block_batch + i) * n_regions
        mask = None
        for r in range(n_regions):
            f0 = rect_f_ref[base + r]
            t0 = rect_t_ref[base + r]
            fmask = (freq_idx >= f0) & (freq_idx < f0 + rect_freq)   # (Fb, 1)
            tmask = (time_idx >= t0) & (time_idx < t0 + rect_time)   # (1, T)
            rect = fmask & tmask                                     # (Fb, T)
            mask = rect if mask is None else (mask | rect)
        xi = x_ref[i]
        o_ref[i] = xi if mask is None else jnp.where(mask, zero, xi)


def _cdiv(a, b):
    return -(-a // b)


def _choose_blocks(B, F, T, itemsize, *, target_bytes=2 << 20,
                   min_tile_bytes=128 << 10, min_steps=8):
    """Pick (batch block bb, #batch blocks nb, #freq blocks nf)."""
    per_item = max(F * T * itemsize, 1)

    # Largest batch block whose tile fits the ~2 MiB streaming sweet spot.
    bb = max(1, min(B, target_bytes // per_item))

    # Never shrink tiles below min_tile_bytes (per-step overhead regime).
    floor_bb = min(bb, max(1, _cdiv(min_tile_bytes, per_item)))

    # Expose enough grid steps for software pipelining / megacore sharding.
    while bb > floor_bb and _cdiv(B, bb) < min_steps:
        bb -= 1

    # Prefer a bb that divides B (no ragged last block) and gives an even
    # number of batch blocks (v7x: 2 TCs share the parallel axis).
    def score(cand):
        nb_c = _cdiv(B, cand)
        return (B % cand == 0, nb_c % 2 == 0, cand)
    bb = max(range(floor_bb, bb + 1), key=score, default=bb)
    nb = _cdiv(B, bb)

    # If the batch axis alone cannot supply enough steps, split F as well
    # (sublane-aligned blocks only; dtype-dependent packing).
    sub = {4: 8, 2: 16, 1: 32}.get(itemsize, 8)
    nf = 1
    while (nb * nf < min_steps and nf < 4
           and F % (2 * nf) == 0 and (F // (2 * nf)) % sub == 0
           and bb * (F // (2 * nf)) * T * itemsize >= min_tile_bytes):
        nf *= 2
    return bb, nb, nf


def spec_cutout_regions(x, rect_f, rect_t, *, rect_freq, rect_time,
                        target_bytes=2 << 20, min_tile_bytes=128 << 10,
                        min_steps=8):
    """x: (B, F, T) float array. rect_f / rect_t: (B, R) int32 start coords."""
    B, F, T = x.shape
    R = rect_f.shape[1]
    if R == 0:
        return x

    itemsize = jnp.dtype(x.dtype).itemsize
    bb, nb, nf = _choose_blocks(
        B, F, T, itemsize, target_bytes=target_bytes,
        min_tile_bytes=min_tile_bytes, min_steps=min_steps)
    Fb = F // nf

    # Flat 1-D scalar-prefetch arrays (a 2-D (B, R) SMEM array would pad the
    # last dim to 128 words).  Pad to nb*bb items so the kernel's SMEM reads
    # stay in bounds even when the last batch block is ragged.
    rect_f_flat = rect_f.reshape(-1).astype(jnp.int32)
    rect_t_flat = rect_t.reshape(-1).astype(jnp.int32)
    pad_items = nb * bb - B
    if pad_items:
        pad = jnp.zeros((pad_items * R,), jnp.int32)
        rect_f_flat = jnp.concatenate([rect_f_flat, pad])
        rect_t_flat = jnp.concatenate([rect_t_flat, pad])

    kernel = functools.partial(
        _cutout_kernel, n_regions=R, rect_freq=rect_freq,
        rect_time=rect_time, block_batch=bb)

    return pl.pallas_call(
        kernel,
        out_shape=jax.ShapeDtypeStruct((B, F, T), x.dtype),
        grid_spec=pltpu.PrefetchScalarGridSpec(
            num_scalar_prefetch=2,
            grid=(nb, nf),
            in_specs=[
                pl.BlockSpec((bb, Fb, T), lambda bi, fi, rf, rt: (bi, fi, 0)),
            ],
            out_specs=pl.BlockSpec((bb, Fb, T),
                                   lambda bi, fi, rf, rt: (bi, fi, 0)),
        ),
        compiler_params=pltpu.CompilerParams(
            dimension_semantics=("parallel", "parallel")),
        cost_estimate=pl.CostEstimate(
            flops=B * F * T * (4 * R + 1),
            transcendentals=0,
            bytes_accessed=2 * B * F * T * itemsize),
    )(rect_f_flat, rect_t_flat, x)


def make_cutout_starts(key, batch, n_regions, freq_dim, time_dim,
                       rect_freq, rect_time):
    """Mimics `int(random.uniform(0, hi))` per (batch, region); hi clamped >= 0."""
    kf, kt = jax.random.split(key)
    f_hi = float(max(freq_dim - rect_freq, 0))
    t_hi = float(max(time_dim - rect_time, 0))
    rect_f = jnp.floor(
        jax.random.uniform(kf, (batch, n_regions), minval=0.0, maxval=f_hi)
    ).astype(jnp.int32)
    rect_t = jnp.floor(
        jax.random.uniform(kt, (batch, n_regions), minval=0.0, maxval=t_hi)
    ).astype(jnp.int32)
    return rect_f, rect_t


def _reference(x, rect_f, rect_t, rect_freq, rect_time):
    B, F, T = x.shape
    freq_idx = jnp.arange(F)[None, :, None, None]   # (1, F, 1, 1)
    time_idx = jnp.arange(T)[None, None, :, None]   # (1, 1, T, 1)
    f0 = rect_f[:, None, None, :]                   # (B, 1, 1, R)
    t0 = rect_t[:, None, None, :]
    mask = ((freq_idx >= f0) & (freq_idx < f0 + rect_freq) &
            (time_idx >= t0) & (time_idx < t0 + rect_time)).any(-1)
    return jnp.where(mask, jnp.zeros((), x.dtype), x)


if __name__ == "__main__":
    # cfg equivalent: cutout_rect_regions=2, cutout_rect_time=5, cutout_rect_freq=20
    cutout_rect_regions = 2
    cutout_rect_time = 5
    cutout_rect_freq = 20

    key = jax.random.PRNGKey(0)

    # --- case 1: lane-aligned T, f32 ---
    B, F, T = 2, 64, 128
    kx, kr, key = jax.random.split(key, 3)
    x = jax.random.normal(kx, (B, F, T), dtype=jnp.float32)
    rect_f, rect_t = make_cutout_starts(
        kr, B, cutout_rect_regions, F, T, cutout_rect_freq, cutout_rect_time)
    out = jax.block_until_ready(
        spec_cutout_regions(x, rect_f, rect_t,
                            rect_freq=cutout_rect_freq,
                            rect_time=cutout_rect_time))
    ref = _reference(x, rect_f, rect_t, cutout_rect_freq, cutout_rect_time)
    assert out.shape == x.shape and out.dtype == x.dtype
    assert jnp.array_equal(out, ref), "mismatch vs reference (f32, T=128)"

    # --- case 2: ragged T (full-dim last block dim, no pad/crop passes) ---
    B2, F2, T2 = 4, 64, 100
    kx2, kr2, key = jax.random.split(key, 3)
    x2 = jax.random.normal(kx2, (B2, F2, T2), dtype=jnp.float32)
    rect_f2, rect_t2 = make_cutout_starts(
        kr2, B2, cutout_rect_regions, F2, T2,
        cutout_rect_freq, cutout_rect_time)
    out2 = jax.block_until_ready(
        spec_cutout_regions(x2, rect_f2, rect_t2,
                            rect_freq=cutout_rect_freq,
                            rect_time=cutout_rect_time))
    ref2 = _reference(x2, rect_f2, rect_t2, cutout_rect_freq, cutout_rect_time)
    assert jnp.array_equal(out2, ref2), "mismatch vs reference (f32, T=100)"

    # --- case 3: bf16, multi-step grid with an F split (tiny tile targets
    #             force the multi-block / split-F path at toy sizes) ---
    B3, F3, T3 = 3, 64, 160
    kx3, kr3 = jax.random.split(key)
    x3 = jax.random.normal(kx3, (B3, F3, T3), dtype=jnp.bfloat16)
    rect_f3, rect_t3 = make_cutout_starts(
        kr3, B3, cutout_rect_regions, F3, T3,
        cutout_rect_freq, cutout_rect_time)
    out3 = jax.block_until_ready(
        spec_cutout_regions(x3, rect_f3, rect_t3,
                            rect_freq=cutout_rect_freq,
                            rect_time=cutout_rect_time,
                            target_bytes=16 << 10, min_tile_bytes=8 << 10))
    ref3 = _reference(x3, rect_f3, rect_t3, cutout_rect_freq, cutout_rect_time)
    assert out3.dtype == jnp.bfloat16
    assert jnp.array_equal(out3, ref3), "mismatch vs reference (bf16, T=160)"

    print("KERNEL_OK")
</pallas_src>

<mosaic_0001>
module attributes {stable_mosaic.version = 11 : i64} {
  func.func @_cutout_kernel(%arg0: i32, %arg1: i32, %arg2: memref<4xi32, #tpu.memory_space<smem>>, %arg3: memref<4xi32, #tpu.memory_space<smem>>, %arg4: memref<2x64x128xf32, #tpu.memory_space<vmem>>, %arg5: memref<2x64x128xf32, #tpu.memory_space<vmem>>) attributes {dimension_semantics = [#tpu.dimension_semantics<parallel>, #tpu.dimension_semantics<parallel>], iteration_bounds = array<i64: 1, 1>, scalar_prefetch = 2 : i64, scratch_operands = 0 : i64, tpu.core_type = #tpu.core_type<tc>, window_params = [{transform_indices = @transform_0, window_bounds = array<i64: 2, 64, 128>}, {transform_indices = @transform_1, window_bounds = array<i64: 2, 64, 128>}]} {
    %c64_i32 = arith.constant 64 : i32
    %0 = arith.muli %arg1, %c64_i32 : i32
    %1 = tpu.iota {dimensions = array<i32: 0>} : vector<64x1xi32>
    %2 = vector.broadcast %0 : i32 to vector<64x1xi32>
    %3 = arith.addi %2, %1 : vector<64x1xi32>
    %4 = tpu.iota {dimensions = array<i32: 1>} : vector<1x128xi32>
    %c2_i32 = arith.constant 2 : i32
    %5 = arith.muli %arg0, %c2_i32 : i32
    %c0_i32 = arith.constant 0 : i32
    %6 = arith.addi %5, %c0_i32 : i32
    %c2_i32_0 = arith.constant 2 : i32
    %7 = arith.muli %6, %c2_i32_0 : i32
    %c0_i32_1 = arith.constant 0 : i32
    %8 = arith.addi %7, %c0_i32_1 : i32
    %9 = arith.index_cast %8 : i32 to index
    %10 = memref.load %arg2[%9] : memref<4xi32, #tpu.memory_space<smem>>
    %c0_i32_2 = arith.constant 0 : i32
    %11 = arith.addi %7, %c0_i32_2 : i32
    %12 = arith.index_cast %11 : i32 to index
    %13 = memref.load %arg3[%12] : memref<4xi32, #tpu.memory_space<smem>>
    %14 = vector.broadcast %10 : i32 to vector<64x1xi32>
    %15 = arith.cmpi sge, %3, %14 : vector<64x1xi32>
    %c20_i32 = arith.constant 20 : i32
    %16 = arith.addi %10, %c20_i32 : i32
    %17 = vector.broadcast %16 : i32 to vector<64x1xi32>
    %18 = arith.cmpi slt, %3, %17 : vector<64x1xi32>
    %19 = arith.andi %15, %18 : vector<64x1xi1>
    %20 = vector.broadcast %13 : i32 to vector<1x128xi32>
    %21 = arith.cmpi sge, %4, %20 : vector<1x128xi32>
    %c5_i32 = arith.constant 5 : i32
    %22 = arith.addi %13, %c5_i32 : i32
    %23 = vector.broadcast %22 : i32 to vector<1x128xi32>
    %24 = arith.cmpi slt, %4, %23 : vector<1x128xi32>
    %25 = arith.andi %21, %24 : vector<1x128xi1>
    %26 = vector.broadcast %19 : vector<64x1xi1> to vector<64x128xi1>
    %27 = vector.broadcast %25 : vector<1x128xi1> to vector<64x128xi1>
    %28 = arith.andi %26, %27 : vector<64x128xi1>
    %c1_i32 = arith.constant 1 : i32
    %29 = arith.addi %7, %c1_i32 : i32
    %30 = arith.index_cast %29 : i32 to index
    %31 = memref.load %arg2[%30] : memref<4xi32, #tpu.memory_space<smem>>
    %c1_i32_3 = arith.constant 1 : i32
    %32 = arith.addi %7, %c1_i32_3 : i32
    %33 = arith.index_cast %32 : i32 to index
    %34 = memref.load %arg3[%33] : memref<4xi32, #tpu.memory_space<smem>>
    %35 = vector.broadcast %31 : i32 to vector<64x1xi32>
    %36 = arith.cmpi sge, %3, %35 : vector<64x1xi32>
    %c20_i32_4 = arith.constant 20 : i32
    %37 = arith.addi %31, %c20_i32_4 : i32
    %38 = vector.broadcast %37 : i32 to vector<64x1xi32>
    %39 = arith.cmpi slt, %3, %38 : vector<64x1xi32>
    %40 = arith.andi %36, %39 : vector<64x1xi1>
    %41 = vector.broadcast %34 : i32 to vector<1x128xi32>
    %42 = arith.cmpi sge, %4, %41 : vector<1x128xi32>
    %c5_i32_5 = arith.constant 5 : i32
    %43 = arith.addi %34, %c5_i32_5 : i32
    %44 = vector.broadcast %43 : i32 to vector<1x128xi32>
    %45 = arith.cmpi slt, %4, %44 : vector<1x128xi32>
    %46 = arith.andi %42, %45 : vector<1x128xi1>
    %47 = vector.broadcast %40 : vector<64x1xi1> to vector<64x128xi1>
    %48 = vector.broadcast %46 : vector<1x128xi1> to vector<64x128xi1>
    %49 = arith.andi %47, %48 : vector<64x128xi1>
    %50 = arith.ori %28, %49 : vector<64x128xi1>
    %c0 = arith.constant 0 : index
    %c0_6 = arith.constant 0 : index
    %c0_7 = arith.constant 0 : index
    %51 = vector.load %arg4[%c0, %c0_6, %c0_7] : memref<2x64x128xf32, #tpu.memory_space<vmem>>, vector<1x64x128xf32>
    %52 = vector.shape_cast %51 : vector<1x64x128xf32> to vector<64x128xf32>
    %cst = arith.constant 0.000000e+00 : f32
    %53 = vector.broadcast %cst : f32 to vector<64x128xf32>
    %54 = arith.select %50, %53, %52 : vector<64x128xi1>, vector<64x128xf32>
    %c0_8 = arith.constant 0 : index
    %c0_9 = arith.constant 0 : index
    %c0_10 = arith.constant 0 : index
    %55 = vector.load %arg5[%c0_8, %c0_9, %c0_10] : memref<2x64x128xf32, #tpu.memory_space<vmem>>, vector<1x64x128xf32>
    %56 = vector.shape_cast %55 : vector<1x64x128xf32> to vector<64x128xf32>
    %57 = vector.shape_cast %54 : vector<64x128xf32> to vector<1x64x128xf32>
    tpu.vector_store %arg5[%c0_8, %c0_9, %c0_10], %57 {strides = array<i32>} : memref<2x64x128xf32, #tpu.memory_space<vmem>>, vector<1x64x128xf32>,
    %c2_i32_11 = arith.constant 2 : i32
    %58 = arith.muli %arg0, %c2_i32_11 : i32
    %c1_i32_12 = arith.constant 1 : i32
    %59 = arith.addi %58, %c1_i32_12 : i32
    %c2_i32_13 = arith.constant 2 : i32
    %60 = arith.muli %59, %c2_i32_13 : i32
    %c0_i32_14 = arith.constant 0 : i32
    %61 = arith.addi %60, %c0_i32_14 : i32
    %62 = arith.index_cast %61 : i32 to index
    %63 = memref.load %arg2[%62] : memref<4xi32, #tpu.memory_space<smem>>
    %c0_i32_15 = arith.constant 0 : i32
    %64 = arith.addi %60, %c0_i32_15 : i32
    %65 = arith.index_cast %64 : i32 to index
    %66 = memref.load %arg3[%65] : memref<4xi32, #tpu.memory_space<smem>>
    %67 = vector.broadcast %63 : i32 to vector<64x1xi32>
    %68 = arith.cmpi sge, %3, %67 : vector<64x1xi32>
    %c20_i32_16 = arith.constant 20 : i32
    %69 = arith.addi %63, %c20_i32_16 : i32
    %70 = vector.broadcast %69 : i32 to vector<64x1xi32>
    %71 = arith.cmpi slt, %3, %70 : vector<64x1xi32>
    %72 = arith.andi %68, %71 : vector<64x1xi1>
    %73 = vector.broadcast %66 : i32 to vector<1x128xi32>
    %74 = arith.cmpi sge, %4, %73 : vector<1x128xi32>
    %c5_i32_17 = arith.constant 5 : i32
    %75 = arith.addi %66, %c5_i32_17 : i32
    %76 = vector.broadcast %75 : i32 to vector<1x128xi32>
    %77 = arith.cmpi slt, %4, %76 : vector<1x128xi32>
    %78 = arith.andi %74, %77 : vector<1x128xi1>
    %79 = vector.broadcast %72 : vector<64x1xi1> to vector<64x128xi1>
    %80 = vector.broadcast %78 : vector<1x128xi1> to vector<64x128xi1>
    %81 = arith.andi %79, %80 : vector<64x128xi1>
    %c1_i32_18 = arith.constant 1 : i32
    %82 = arith.addi %60, %c1_i32_18 : i32
    %83 = arith.index_cast %82 : i32 to index
    %84 = memref.load %arg2[%83] : memref<4xi32, #tpu.memory_space<smem>>
    %c1_i32_19 = arith.constant 1 : i32
    %85 = arith.addi %60, %c1_i32_19 : i32
    %86 = arith.index_cast %85 : i32 to index
    %87 = memref.load %arg3[%86] : memref<4xi32, #tpu.memory_space<smem>>
    %88 = vector.broadcast %84 : i32 to vector<64x1xi32>
    %89 = arith.cmpi sge, %3, %88 : vector<64x1xi32>
    %c20_i32_20 = arith.constant 20 : i32
    %90 = arith.addi %84, %c20_i32_20 : i32
    %91 = vector.broadcast %90 : i32 to vector<64x1xi32>
    %92 = arith.cmpi slt, %3, %91 : vector<64x1xi32>
    %93 = arith.andi %89, %92 : vector<64x1xi1>
    %94 = vector.broadcast %87 : i32 to vector<1x128xi32>
    %95 = arith.cmpi sge, %4, %94 : vector<1x128xi32>
    %c5_i32_21 = arith.constant 5 : i32
    %96 = arith.addi %87, %c5_i32_21 : i32
    %97 = vector.broadcast %96 : i32 to vector<1x128xi32>
    %98 = arith.cmpi slt, %4, %97 : vector<1x128xi32>
    %99 = arith.andi %95, %98 : vector<1x128xi1>
    %100 = vector.broadcast %93 : vector<64x1xi1> to vector<64x128xi1>
    %101 = vector.broadcast %99 : vector<1x128xi1> to vector<64x128xi1>
    %102 = arith.andi %100, %101 : vector<64x128xi1>
    %103 = arith.ori %81, %102 : vector<64x128xi1>
    %c1 = arith.constant 1 : index
    %c0_22 = arith.constant 0 : index
    %c0_23 = arith.constant 0 : index
    %104 = vector.load %arg4[%c1, %c0_22, %c0_23] : memref<2x64x128xf32, #tpu.memory_space<vmem>>, vector<1x64x128xf32>
    %105 = vector.shape_cast %104 : vector<1x64x128xf32> to vector<64x128xf32>
    %cst_24 = arith.constant 0.000000e+00 : f32
    %106 = vector.broadcast %cst_24 : f32 to vector<64x128xf32>
    %107 = arith.select %103, %106, %105 : vector<64x128xi1>, vector<64x128xf32>
    %c1_25 = arith.constant 1 : index
    %c0_26 = arith.constant 0 : index
    %c0_27 = arith.constant 0 : index
    %108 = vector.load %arg5[%c1_25, %c0_26, %c0_27] : memref<2x64x128xf32, #tpu.memory_space<vmem>>, vector<1x64x128xf32>
    %109 = vector.shape_cast %108 : vector<1x64x128xf32> to vector<64x128xf32>
    %110 = vector.shape_cast %107 : vector<64x128xf32> to vector<1x64x128xf32>
    tpu.vector_store %arg5[%c1_25, %c0_26, %c0_27], %110 {strides = array<i32>} : memref<2x64x128xf32, #tpu.memory_space<vmem>>, vector<1x64x128xf32>,
    return
  }
  func.func @transform_0(%arg0: i32, %arg1: i32, %arg2: memref<4xi32, #tpu.memory_space<smem>>, %arg3: memref<4xi32, #tpu.memory_space<smem>>) -> (i32, i32, i32) {
    %c0_i32 = arith.constant 0 : i32
    %c0_i32_0 = arith.constant 0 : i32
    return %arg0, %arg1, %c0_i32 : i32, i32, i32
  }
  func.func @transform_1(%arg0: i32, %arg1: i32, %arg2: memref<4xi32, #tpu.memory_space<smem>>, %arg3: memref<4xi32, #tpu.memory_space<smem>>) -> (i32, i32, i32) {
    %c0_i32 = arith.constant 0 : i32
    %c0_i32_0 = arith.constant 0 : i32
    return %arg0, %arg1, %c0_i32 : i32, i32, i32
  }
}

</mosaic_0001>

<bundles_post_ra>
// kernel: tpu_custom_call.1
= control target key start
LH: loop header
LB: loop body
LE: loop exit
PB: predicated region body
PF: predicated region fallthrough
CT: control target
= control target key end

     0   :  { %s486_s18 = smov [#allocation3]   ;;  %s487_s19 = smov [#allocation4]   ;;  %s821_s0 = inlined_call_operand.hbm [shape: s32[4], index: 0, kind: input, shape index: {}]   ;;  %s822_s2 = inlined_call_operand.hbm [shape: f32[2,64,128], index: 2, kind: input, shape index: {}]   ;;  %s823_s3 = inlined_call_operand.hbm [shape: f32[2,64,128], index: 3, kind: output, shape index: {}]   ;;  %s824_s1 = inlined_call_operand.hbm [shape: s32[4], index: 1, kind: input, shape index: {}]  }
   0x1   :  { %s9_s14 = sshll.u32 %s821_s0, 4  ;;  %s14_s17 = sshll.u32 %s824_s1, 4  ;;  %s10_s14 = int_to_ptr.hbm [resolvable:$true] %s9_s14  ;;  %s15_s17 = int_to_ptr.hbm [resolvable:$true] %s14_s17 }
   0x2   :  { %12 = dma.hbm_to_smem %s10_s14, 16, %s486_s18, [#allocation2] }
   0x3   :  { %17 = dma.hbm_to_smem %s15_s17, 16, %s487_s19, [#allocation2] }
   0x4   :  { %480 = dma.done.wait [#allocation2], 32 }
   0x5   :  { %481 = vsyncadd [#allocation2], 4294967264 }
   0x6   :  { %20 = sfence }
   0x7   :  { %21 = vsyncpa [#allocation6], 0 }
   0x8   :  { %22 = vsyncpa [#allocation7], 0  ;;  %s27_s22 = sshll.u32 %s822_s2, 4  ;;  %s488_s0 = smov [#allocation5]   ;;  %s28_s22 = int_to_ptr.hbm [resolvable:$true] %s27_s22 }
   0x9   :  { %s29_s23 = sshll.u32 %s488_s0, 4  ;;  %s489_s1 = smov 128   ;;  %s30_s23 = int_to_ptr.vmem [resolvable:$true] %s29_s23 }
   0xa   :  { %s490_s24 = smov 8  }
   0xb   :  { %35 = dma.hbm_to_vmem [thread:$0]  %s28_s22, 2048, %s30_s23, [#allocation6], %s489_s1, %s489_s1, %s490_s24  }
   0xc   :  { %482 = dma.done.wait [#allocation6], 2048  }
   0xd   :  { %483 = vsyncadd [#allocation6], 4294965248  ;;  %v41_v0 = vlaneseq  ;;  %s62_s25 = sld [smem:[#allocation3]]  ;;  %v193_v15 = vld [vmem:[#allocation5] sm:$0xff]  ;;  %v194_v18 = vld [vmem:[#allocation5 + $0x8] sm:$0xff]  ;;  %s491_s13 = smov [#allocation8]  }
   0xe   :  { %s63_s26 = sld [smem:[#allocation4]]  ;;  %v195_v21 = vld [vmem:[#allocation5 + $0x10] sm:$0xff]  ;;  %v196_v24 = vld [vmem:[#allocation5 + $0x18] sm:$0xff]  ;;  %v197_v27 = vld [vmem:[#allocation5 + $0x20] sm:$0xff]  ;;  %s381_s14 = sshll.u32 %s491_s13, 4  ;;  %s382_s14 = int_to_ptr.vmem [resolvable:$true] %s381_s14 }
   0xf   :  { %s396_s27 = sld [smem:[#allocation3 + $0x1]]  ;;  %v524_v1 = vshrl.u32 %v41_v0, 7  ;;  %v526_v2 = vand.u32 127, %v41_v0  ;;  %v198_v30 = vld [vmem:[#allocation5 + $0x28] sm:$0xff]  ;;  %v199_v33 = vld [vmem:[#allocation5 + $0x30] sm:$0xff]  ;;  %v200_v40 = vld [vmem:[#allocation5 + $0x38] sm:$0xff] }
  0x10   :  { %s397_s28 = sld [smem:[#allocation4 + $0x1]]  ;;  %v352_v49 = vld [vmem:[#allocation5 + $0x40] sm:$0xff]  ;;  %v353_v51 = vld [vmem:[#allocation5 + $0x48] sm:$0xff]  ;;  %v354_v53 = vld [vmem:[#allocation5 + $0x50] sm:$0xff]  ;;  %s383_s17 = sshll.u32 %s823_s3, 4  ;;  %s384_s17 = int_to_ptr.hbm [resolvable:$true] %s383_s17 }
  0x11   :  { %v535_v6 = vadd.s32 8, %v524_v1  ;;  %v574_v16 = vadd.s32 16, %v524_v1  ;;  %v589_v19 = vadd.s32 24, %v524_v1  ;;  %v604_v22 = vadd.s32 32, %v524_v1  ;;  %s636_s5 = sld [smem:[#allocation3 + $0x2]]  ;;  %v355_v55 = vld [vmem:[#allocation5 + $0x58] sm:$0xff] }
  0x12   :  { %v619_v25 = vadd.s32 40, %v524_v1  ;;  %v634_v28 = vadd.s32 48, %v524_v1  ;;  %s642_s6 = sld [smem:[#allocation4 + $0x2]]  ;;  %v657_v31 = vadd.s32 56, %v524_v1  ;;  %v356_v57 = vld [vmem:[#allocation5 + $0x60] sm:$0xff]  ;;  %v357_v59 = vld [vmem:[#allocation5 + $0x68] sm:$0xff] }
  0x13   :  { %v528_v3 = vstv %s62_s25  ;;  %s73_s2 = sadd.s32 20, %s62_s25  ;;  %s646_s7 = sld [smem:[#allocation3 + $0x3]]  ;;  %v358_v61 = vld [vmem:[#allocation5 + $0x70] sm:$0xff]  ;;  %v359_v63 = vld [vmem:[#allocation5 + $0x78] sm:$0xff] }
  0x14   :  { %vm65_vm0 = vcmp.ge.s32.totalorder %v524_v1, %v528_v3  ;;  %v532_v4 = vstv %s73_s2  ;;  %v91_v5 = vstv %s63_s26  ;;  %s93_s29 = sadd.s32 5, %s63_s26  ;;  %vm66_vm13 = vcmp.ge.s32.totalorder %v535_v6, %v528_v3  ;;  %s652_s8 = sld [smem:[#allocation4 + $0x3]] }
  0x15   :  { %vm75_vm1 = vcmp.lt.s32.totalorder %v524_v1, %v532_v4  ;;  %vm92_vm2 = vcmp.ge.s32.totalorder %v526_v2, %v91_v5  ;;  %v94_v7 = vstv %s93_s29  ;;  %v540_v8 = vstv %s396_s27  ;;  %s135_s30 = sadd.s32 20, %s396_s27 }
  0x16   :  { %vm542_vm3 = vmand %vm65_vm0, %vm75_vm1  ;;  %vm95_vm4 = vcmp.lt.s32.totalorder %v526_v2, %v94_v7  ;;  %vm127_vm5 = vcmp.ge.s32.totalorder %v524_v1, %v540_v8  ;;  %v549_v10 = vstv %s135_s30  ;;  %v153_v11 = vstv %s397_s28  ;;  %s155_s4 = sadd.s32 5, %s397_s28 }
  0x17   :  { %vm551_vm6 = vmand %vm92_vm2, %vm95_vm4  ;;  %vm137_vm7 = vcmp.lt.s32.totalorder %v524_v1, %v549_v10  ;;  %vm154_vm8 = vcmp.ge.s32.totalorder %v526_v2, %v153_v11  ;;  %v156_v13 = vstv %s155_s4  ;;  %vm76_vm14 = vcmp.lt.s32.totalorder %v535_v6, %v532_v4  ;;  %s231_s9 = sadd.s32 20, %s636_s5 }
  0x18   :  { %vm115_vm9 = vmand %vm542_vm3, %vm551_vm6  ;;  %vm157_vm10 = vcmp.lt.s32.totalorder %v526_v2, %v156_v13  ;;  %vm128_vm1 = vcmp.ge.s32.totalorder %v535_v6, %v540_v8  ;;  %vm138_vm2 = vcmp.lt.s32.totalorder %v535_v6, %v549_v10  ;;  %s251_s10 = sadd.s32 5, %s642_s6  ;;  %v678_v34 = vstv %s636_s5 }
  0x19   :  { %vm145_vm11 = vmand %vm127_vm5, %vm137_vm7  ;;  %vm67_vm7 = vcmp.ge.s32.totalorder %v574_v16, %v528_v3  ;;  %v680_v35 = vstv %s231_s9  ;;  %s293_s11 = sadd.s32 20, %s646_s7  ;;  %v249_v38 = vstv %s642_s6  ;;  %v252_v39 = vstv %s251_s10 }
  0x1a   :  { %vm563_vm12 = vmand %vm154_vm8, %vm157_vm10  ;;  %vm77_vm8 = vcmp.lt.s32.totalorder %v574_v16, %v532_v4  ;;  %s313_s12 = sadd.s32 5, %s652_s8  ;;  %v698_v41 = vstv %s646_s7  ;;  %v700_v42 = vstv %s293_s11  ;;  %v311_v43 = vstv %s652_s8 }
  0x1b   :  { %vm177_vm15 = vmand %vm145_vm11, %vm563_vm12  ;;  %vm129_vm11 = vcmp.ge.s32.totalorder %v574_v16, %v540_v8  ;;  %v314_v44 = vstv %s313_s12 }
  0x1c   :  { %vm185_vm0 = vmor %vm115_vm9, %vm177_vm15 }
  0x1d   :  { %v201_v17 = vsel %vm185_vm0, 0.0, %v193_v15  ;;  %vm84_vm3 = vmand %vm66_vm13, %vm76_vm14  ;;  %vm139_vm13 = vcmp.lt.s32.totalorder %v574_v16, %v549_v10 }
  0x1e   :  { %209 = vst [vmem:[#allocation8] sm:$0xff] %v201_v17  ;;  %vm116_vm4 = vmand %vm84_vm3, %vm551_vm6 }
  0x1f   :  { %vm146_vm5 = vmand %vm128_vm1, %vm138_vm2  ;;  %vm68_vm1 = vcmp.ge.s32.totalorder %v589_v19, %v528_v3  ;;  %vm78_vm2 = vcmp.lt.s32.totalorder %v589_v19, %v532_v4 }
  0x20   :  { %vm178_vm9 = vmand %vm146_vm5, %vm563_vm12  ;;  %vm130_vm5 = vcmp.ge.s32.totalorder %v589_v19, %v540_v8 }
  0x21   :  { %vm186_vm10 = vmor %vm116_vm4, %vm178_vm9 }
  0x22   :  { %v202_v20 = vsel %vm186_vm10, 0.0, %v194_v18  ;;  %vm85_vm14 = vmand %vm67_vm7, %vm77_vm8  ;;  %vm140_vm7 = vcmp.lt.s32.totalorder %v589_v19, %v549_v10 }
  0x23   :  { %210 = vst [vmem:[#allocation8 + $0x8] sm:$0xff] %v202_v20  ;;  %vm117_vm15 = vmand %vm85_vm14, %vm551_vm6 }
  0x24   :  { %vm147_vm0 = vmand %vm129_vm11, %vm139_vm13  ;;  %vm69_vm11 = vcmp.ge.s32.totalorder %v604_v22, %v528_v3  ;;  %vm79_vm13 = vcmp.lt.s32.totalorder %v604_v22, %v532_v4 }
  0x25   :  { %vm179_vm3 = vmand %vm147_vm0, %vm563_vm12  ;;  %vm131_vm0 = vcmp.ge.s32.totalorder %v604_v22, %v540_v8 }
  0x26   :  { %vm187_vm4 = vmor %vm117_vm15, %vm179_vm3 }
  0x27   :  { %v203_v23 = vsel %vm187_vm4, 0.0, %v195_v21  ;;  %vm86_vm8 = vmand %vm68_vm1, %vm78_vm2  ;;  %vm141_vm1 = vcmp.lt.s32.totalorder %v604_v22, %v549_v10 }
  0x28   :  { %211 = vst [vmem:[#allocation8 + $0x10] sm:$0xff] %v203_v23  ;;  %vm118_vm9 = vmand %vm86_vm8, %vm551_vm6 }
  0x29   :  { %vm148_vm10 = vmand %vm130_vm5, %vm140_vm7  ;;  %vm70_vm5 = vcmp.ge.s32.totalorder %v619_v25, %v528_v3  ;;  %vm80_vm7 = vcmp.lt.s32.totalorder %v619_v25, %v532_v4 }
  0x2a   :  { %vm180_vm14 = vmand %vm148_vm10, %vm563_vm12  ;;  %vm132_vm10 = vcmp.ge.s32.totalorder %v619_v25, %v540_v8 }
  0x2b   :  { %vm188_vm15 = vmor %vm118_vm9, %vm180_vm14 }
  0x2c   :  { %v204_v26 = vsel %vm188_vm15, 0.0, %v196_v24  ;;  %vm87_vm2 = vmand %vm69_vm11, %vm79_vm13  ;;  %vm142_vm11 = vcmp.lt.s32.totalorder %v619_v25, %v549_v10 }
  0x2d   :  { %212 = vst [vmem:[#allocation8 + $0x18] sm:$0xff] %v204_v26  ;;  %vm119_vm3 = vmand %vm87_vm2, %vm551_vm6 }
  0x2e   :  { %vm149_vm4 = vmand %vm131_vm0, %vm141_vm1  ;;  %vm71_vm0 = vcmp.ge.s32.totalorder %v634_v28, %v528_v3  ;;  %vm81_vm1 = vcmp.lt.s32.totalorder %v634_v28, %v532_v4 }
  0x2f   :  { %vm181_vm8 = vmand %vm149_vm4, %vm563_vm12  ;;  %vm133_vm4 = vcmp.ge.s32.totalorder %v634_v28, %v540_v8 }
  0x30   :  { %vm189_vm9 = vmor %vm119_vm3, %vm181_vm8 }
  0x31   :  { %v205_v29 = vsel %vm189_vm9, 0.0, %v197_v27  ;;  %vm88_vm13 = vmand %vm70_vm5, %vm80_vm7  ;;  %vm143_vm5 = vcmp.lt.s32.totalorder %v634_v28, %v549_v10 }
  0x32   :  { %213 = vst [vmem:[#allocation8 + $0x20] sm:$0xff] %v205_v29  ;;  %vm120_vm14 = vmand %vm88_vm13, %vm551_vm6 }
  0x33   :  { %vm150_vm15 = vmand %vm132_vm10, %vm142_vm11  ;;  %vm72_vm10 = vcmp.ge.s32.totalorder %v657_v31, %v528_v3  ;;  %vm82_vm11 = vcmp.lt.s32.totalorder %v657_v31, %v532_v4 }
  0x34   :  { %vm182_vm2 = vmand %vm150_vm15, %vm563_vm12  ;;  %vm134_vm15 = vcmp.ge.s32.totalorder %v657_v31, %v540_v8 }
  0x35   :  { %vm190_vm3 = vmor %vm120_vm14, %vm182_vm2 }
  0x36   :  { %v206_v32 = vsel %vm190_vm3, 0.0, %v198_v30  ;;  %vm89_vm7 = vmand %vm71_vm0, %vm81_vm1  ;;  %vm144_vm0 = vcmp.lt.s32.totalorder %v657_v31, %v549_v10 }
  0x37   :  { %214 = vst [vmem:[#allocation8 + $0x28] sm:$0xff] %v206_v32  ;;  %vm121_vm8 = vmand %vm89_vm7, %vm551_vm6 }
  0x38   :  { %vm151_vm9 = vmand %vm133_vm4, %vm143_vm5  ;;  %vm223_vm4 = vcmp.ge.s32.totalorder %v524_v1, %v678_v34  ;;  %vm233_vm5 = vcmp.lt.s32.totalorder %v524_v1, %v680_v35 }
  0x39   :  { %vm183_vm13 = vmand %vm151_vm9, %vm563_vm12  ;;  %vm253_vm9 = vcmp.lt.s32.totalorder %v526_v2, %v252_v39 }
  0x3a   :  { %vm191_vm14 = vmor %vm121_vm8, %vm183_vm13  ;;  %vm250_vm8 = vcmp.ge.s32.totalorder %v526_v2, %v249_v38  ;;  %vm295_vm13 = vcmp.lt.s32.totalorder %v524_v1, %v700_v42 }
  0x3b   :  { %v207_v36 = vsel %vm191_vm14, 0.0, %v199_v33  ;;  %vm683_vm1 = vmand %vm72_vm10, %vm82_vm11  ;;  %vm285_vm11 = vcmp.ge.s32.totalorder %v524_v1, %v698_v41  ;;  %vm312_vm14 = vcmp.ge.s32.totalorder %v526_v2, %v311_v43 }
  0x3c   :  { %215 = vst [vmem:[#allocation8 + $0x30] sm:$0xff] %v207_v36  ;;  %vm122_vm2 = vmand %vm683_vm1, %vm551_vm6 }
  0x3d   :  { %vm152_vm3 = vmand %vm134_vm15, %vm144_vm0  ;;  %vm315_vm15 = vcmp.lt.s32.totalorder %v526_v2, %v314_v44 }
  0x3e   :  { %vm184_vm7 = vmand %vm152_vm3, %vm563_vm12  ;;  %vm224_vm3 = vcmp.ge.s32.totalorder %v535_v6, %v678_v34 }
  0x3f   :  { %vm192_vm6 = vmor %vm122_vm2, %vm184_vm7 }
  0x40   :  { %v208_v45 = vsel %vm192_vm6, 0.0, %v200_v40  ;;  %vm707_vm10 = vmand %vm223_vm4, %vm233_vm5  ;;  %vm234_vm4 = vcmp.lt.s32.totalorder %v535_v6, %v680_v35 }
  0x41   :  { %216 = vst [vmem:[#allocation8 + $0x38] sm:$0xff] %v208_v45  ;;  %vm715_vm12 = vmand %vm250_vm8, %vm253_vm9  ;;  %vm286_vm8 = vcmp.ge.s32.totalorder %v535_v6, %v698_v41  ;;  %vm296_vm9 = vcmp.lt.s32.totalorder %v535_v6, %v700_v42 }
  0x42   :  { %vm273_vm0 = vmand %vm707_vm10, %vm715_vm12 }
  0x43   :  { %vm303_vm1 = vmand %vm285_vm11, %vm295_vm13  ;;  %vm225_vm13 = vcmp.ge.s32.totalorder %v574_v16, %v678_v34 }
  0x44   :  { %vm725_vm2 = vmand %vm312_vm14, %vm315_vm15  ;;  %vm235_vm14 = vcmp.lt.s32.totalorder %v574_v16, %v680_v35 }
  0x45   :  { %vm335_vm5 = vmand %vm303_vm1, %vm725_vm2  ;;  %vm287_vm1 = vcmp.ge.s32.totalorder %v574_v16, %v698_v41 }
  0x46   :  { %vm343_vm7 = vmor %vm273_vm0, %vm335_vm5 }
  0x47   :  { %v360_v50 = vsel %vm343_vm7, 0.0, %v352_v49  ;;  %vm242_vm6 = vmand %vm224_vm3, %vm234_vm4  ;;  %vm297_vm3 = vcmp.lt.s32.totalorder %v574_v16, %v700_v42 }
  0x48   :  { %369 = vst [vmem:[#allocation8 + $0x40] sm:$0xff] %v360_v50  ;;  %vm274_vm10 = vmand %vm242_vm6, %vm715_vm12 }
  0x49   :  { %vm304_vm11 = vmand %vm286_vm8, %vm296_vm9  ;;  %vm226_vm8 = vcmp.ge.s32.totalorder %v589_v19, %v678_v34  ;;  %vm236_vm9 = vcmp.lt.s32.totalorder %v589_v19, %v680_v35 }
  0x4a   :  { %vm336_vm15 = vmand %vm304_vm11, %vm725_vm2  ;;  %vm288_vm11 = vcmp.ge.s32.totalorder %v589_v19, %v698_v41 }
  0x4b   :  { %vm344_vm0 = vmor %vm274_vm10, %vm336_vm15 }
  0x4c   :  { %v361_v52 = vsel %vm344_vm0, 0.0, %v353_v51  ;;  %vm243_vm4 = vmand %vm225_vm13, %vm235_vm14  ;;  %vm298_vm13 = vcmp.lt.s32.totalorder %v589_v19, %v700_v42 }
  0x4d   :  { %370 = vst [vmem:[#allocation8 + $0x48] sm:$0xff] %v361_v52  ;;  %vm275_vm5 = vmand %vm243_vm4, %vm715_vm12 }
  0x4e   :  { %vm305_vm7 = vmand %vm287_vm1, %vm297_vm3  ;;  %vm227_vm1 = vcmp.ge.s32.totalorder %v604_v22, %v678_v34  ;;  %vm237_vm3 = vcmp.lt.s32.totalorder %v604_v22, %v680_v35 }
  0x4f   :  { %vm337_vm6 = vmand %vm305_vm7, %vm725_vm2  ;;  %vm289_vm7 = vcmp.ge.s32.totalorder %v604_v22, %v698_v41 }
  0x50   :  { %vm345_vm10 = vmor %vm275_vm5, %vm337_vm6 }
  0x51   :  { %v362_v54 = vsel %vm345_vm10, 0.0, %v354_v53  ;;  %vm244_vm14 = vmand %vm226_vm8, %vm236_vm9  ;;  %vm299_vm8 = vcmp.lt.s32.totalorder %v604_v22, %v700_v42 }
  0x52   :  { %371 = vst [vmem:[#allocation8 + $0x50] sm:$0xff] %v362_v54  ;;  %vm276_vm15 = vmand %vm244_vm14, %vm715_vm12 }
  0x53   :  { %vm306_vm0 = vmand %vm288_vm11, %vm298_vm13  ;;  %vm228_vm11 = vcmp.ge.s32.totalorder %v619_v25, %v678_v34  ;;  %vm238_vm13 = vcmp.lt.s32.totalorder %v619_v25, %v680_v35 }
  0x54   :  { %vm338_vm4 = vmand %vm306_vm0, %vm725_vm2  ;;  %vm290_vm0 = vcmp.ge.s32.totalorder %v619_v25, %v698_v41 }
  0x55   :  { %vm346_vm5 = vmor %vm276_vm15, %vm338_vm4 }
  0x56   :  { %v363_v56 = vsel %vm346_vm5, 0.0, %v355_v55  ;;  %vm245_vm9 = vmand %vm227_vm1, %vm237_vm3  ;;  %vm300_vm1 = vcmp.lt.s32.totalorder %v619_v25, %v700_v42 }
  0x57   :  { %372 = vst [vmem:[#allocation8 + $0x58] sm:$0xff] %v363_v56  ;;  %vm277_vm6 = vmand %vm245_vm9, %vm715_vm12 }
  0x58   :  { %vm307_vm10 = vmand %vm289_vm7, %vm299_vm8  ;;  %vm229_vm7 = vcmp.ge.s32.totalorder %v634_v28, %v678_v34  ;;  %vm239_vm8 = vcmp.lt.s32.totalorder %v634_v28, %v680_v35 }
  0x59   :  { %vm339_vm14 = vmand %vm307_vm10, %vm725_vm2  ;;  %vm291_vm10 = vcmp.ge.s32.totalorder %v634_v28, %v698_v41 }
  0x5a   :  { %vm347_vm15 = vmor %vm277_vm6, %vm339_vm14 }
  0x5b   :  { %v364_v58 = vsel %vm347_vm15, 0.0, %v356_v57  ;;  %vm246_vm3 = vmand %vm228_vm11, %vm238_vm13  ;;  %vm301_vm11 = vcmp.lt.s32.totalorder %v634_v28, %v700_v42 }
  0x5c   :  { %373 = vst [vmem:[#allocation8 + $0x60] sm:$0xff] %v364_v58  ;;  %vm278_vm4 = vmand %vm246_vm3, %vm715_vm12 }
  0x5d   :  { %vm308_vm5 = vmand %vm290_vm0, %vm300_vm1  ;;  %vm230_vm0 = vcmp.ge.s32.totalorder %v657_v31, %v678_v34  ;;  %vm240_vm1 = vcmp.lt.s32.totalorder %v657_v31, %v680_v35 }
  0x5e   :  { %vm340_vm9 = vmand %vm308_vm5, %vm725_vm2  ;;  %vm292_vm5 = vcmp.ge.s32.totalorder %v657_v31, %v698_v41 }
  0x5f   :  { %vm348_vm6 = vmor %vm278_vm4, %vm340_vm9 }
  0x60   :  { %v365_v60 = vsel %vm348_vm6, 0.0, %v357_v59  ;;  %vm247_vm13 = vmand %vm229_vm7, %vm239_vm8  ;;  %vm302_vm7 = vcmp.lt.s32.totalorder %v657_v31, %v700_v42 }
  0x61   :  { %374 = vst [vmem:[#allocation8 + $0x68] sm:$0xff] %v365_v60  ;;  %vm279_vm14 = vmand %vm247_vm13, %vm715_vm12 }
  0x62   :  { %vm309_vm15 = vmand %vm291_vm10, %vm301_vm11 }
  0x63   :  { %vm341_vm3 = vmand %vm309_vm15, %vm725_vm2 }
  0x64   :  { %vm349_vm4 = vmor %vm279_vm14, %vm341_vm3 }
  0x65   :  { %v366_v62 = vsel %vm349_vm4, 0.0, %v358_v61  ;;  %vm248_vm8 = vmand %vm230_vm0, %vm240_vm1 }
  0x66   :  { %375 = vst [vmem:[#allocation8 + $0x70] sm:$0xff] %v366_v62  ;;  %vm280_vm9 = vmand %vm248_vm8, %vm715_vm12 }
  0x67   :  { %vm310_vm6 = vmand %vm292_vm5, %vm302_vm7 }
  0x68   :  { %vm342_vm10 = vmand %vm310_vm6, %vm725_vm2 }
  0x69   :  { %vm350_vm11 = vmor %vm280_vm9, %vm342_vm10 }
  0x6a   :  { %v367_v0 = vsel %vm350_vm11, 0.0, %v359_v63 }
  0x6b   :  { %376 = vst [vmem:[#allocation8 + $0x78] sm:$0xff] %v367_v0 }
  0x6c   :  { %389 = dma.vmem_to_hbm [thread:$0]  %s382_s14, 2048, %s384_s17, [#allocation7], %s489_s1, %s489_s1, %s490_s24  }
  0x6d   :  { %484 = dma.done.wait [#allocation7], 2048  }
  0x6e   :  { %485 = vsyncadd [#allocation7], 4294965248 }
  0x6f   :  { %394 = vsyncpa [#allocation6], 1 }
  0x70   :  { %395 = vsyncpa [#allocation7], 1 }

</bundles_post_ra>
